<compile_context>
chip_gen: v7x
topology: tpu7x:2x2x1
jax: 0.10.0
libtpu: 0.0.40
codegen_flags: <defaults>
</compile_context>

<pallas_src>
import functools

import jax
import jax.numpy as jnp
from jax import lax
from jax.experimental import pallas as pl
from jax.experimental.pallas import tpu as pltpu


def _round_up(x, m):
    return (x + m - 1) // m * m


def rnn_fc_kernel(tok_ref, p_ref, whh_ref, wfc_ref, bfc_ref,
                  out_ref, hn_ref, xp_scratch, h_scratch,
                  *, Bp, Tt, T_true, needs_mask):
    """One grid step = one chunk of Tt timesteps.

    tok_ref  : (T_pad*Bp,) int32  SMEM  time-major token ids (scalar prefetch)
    p_ref    : (Vp, Hp)    f32    VMEM  fused table: emb @ W_ih^T + (b_ih+b_hh)
    whh_ref  : (Hp, Hp)    bf16   VMEM  W_hh^T (zero padded), resident
    wfc_ref  : (Hp, Op)    bf16   VMEM  W_fc^T (zero padded), resident
    bfc_ref  : (1, Op)     f32    VMEM  fc bias
    out_ref  : (Bp, Op)    f32          fc(h_T)
    hn_ref   : (Bp, Hp)    f32          final hidden state
    xp_scratch:(Tt*Bp, Hp) f32    VMEM  staged input projections for this chunk
    h_scratch: (Bp, Hp)    f32    VMEM  hidden state carried across grid steps
    """
    t = pl.program_id(0)

    @pl.when(t == 0)
    def _init():
        h_scratch[...] = jnp.zeros_like(h_scratch)  # h_0 = 0 (PyTorch default)

    base = t * (Tt * Bp)

    # Stage this chunk's fused input projections into VMEM scratch via an
    # SMEM-id row gather from the tiny resident table (off the serial chain).
    @pl.loop(0, Tt)
    def _gather(i):
        off = pl.multiple_of(i * Bp, 8)
        for b in range(Bp):                       # static: Bp sublane rows
            tok = tok_ref[base + off + b]
            xp_scratch[pl.ds(off + b, 1), :] = p_ref[pl.ds(tok, 1), :]

    whh = whh_ref[...]                            # (Hp, Hp) bf16, resident

    # Serial recurrence: only h @ W_hh^T + tanh on the critical path.
    def rec_step(i, h):
        rec = jnp.dot(h.astype(jnp.bfloat16), whh,
                      preferred_element_type=jnp.float32)      # (Bp, Hp) f32
        off = pl.multiple_of(i * Bp, 8)
        h_new = jnp.tanh(xp_scratch[pl.ds(off, Bp), :] + rec)   # f32 tanh
        if needs_mask:                            # static: only if T was padded
            valid = (t * Tt + i) < T_true
            h_new = jnp.where(valid, h_new, h)    # padded steps leave h intact
        return h_new

    h = lax.fori_loop(0, Tt, rec_step, h_scratch[...], unroll=min(8, Tt))
    h_scratch[...] = h

    @pl.when(t == pl.num_programs(0) - 1)
    def _finalize():
        hn_ref[...] = h
        out_ref[...] = (jnp.dot(h.astype(jnp.bfloat16), wfc_ref[...],
                                preferred_element_type=jnp.float32)
                        + bfc_ref[...])


def init_params(key, vocab_size, embedding_dim, hidden_size, output_size):
    """Deterministic synthetic parameters matching nn.Embedding / nn.RNN / nn.Linear."""
    ks = jax.random.split(key, 7)
    s = 1.0 / jnp.sqrt(hidden_size)
    return {
        "embedding": jax.random.normal(ks[0], (vocab_size, embedding_dim), jnp.float32),
        "w_ih": jax.random.uniform(ks[1], (hidden_size, embedding_dim), jnp.float32, -s, s),
        "w_hh": jax.random.uniform(ks[2], (hidden_size, hidden_size), jnp.float32, -s, s),
        "b_ih": jax.random.uniform(ks[3], (hidden_size,), jnp.float32, -s, s),
        "b_hh": jax.random.uniform(ks[4], (hidden_size,), jnp.float32, -s, s),
        "w_fc": jax.random.uniform(ks[5], (output_size, hidden_size), jnp.float32, -s, s),
        "b_fc": jax.random.uniform(ks[6], (output_size,), jnp.float32, -s, s),
    }


def rnn_model_forward(x_tokens, params, *, t_chunk_cap=64):
    """Equivalent of RNNModel.forward: returns (fc(out[:, -1, :]), hn)."""
    B, T = x_tokens.shape
    V, E = params["embedding"].shape
    H = params["w_hh"].shape[0]
    O = params["w_fc"].shape[0]

    # vreg-native padding: batch -> multiple of 8 (sublane), features -> 128 (lane).
    Bp = _round_up(B, 8)
    Hp = _round_up(H, 128)
    Op = _round_up(O, 128)
    Vp = _round_up(V, 8)

    # Fixed, 8-aligned time chunk; pad T up to a multiple (padded steps masked in-kernel).
    Tt = min(t_chunk_cap, _round_up(T, 8))
    T_pad = _round_up(T, Tt)
    n_chunks = T_pad // Tt

    # ---- wrapper-side parameter prep (all tiny / one-time) ----
    # Fused table: embedding followed by the input-side affine map of the RNN cell.
    p_tbl = (params["embedding"] @ params["w_ih"].T
             + params["b_ih"] + params["b_hh"])                        # (V, H) f32
    p_tbl = jnp.pad(p_tbl, ((0, Vp - V), (0, Hp - H)))                 # (Vp, Hp)

    # Token ids: pad batch/time, time-major, flattened -> SMEM scalar prefetch.
    tok = jnp.pad(x_tokens, ((0, Bp - B), (0, T_pad - T))).astype(jnp.int32)
    tok_flat = tok.T.reshape(T_pad * Bp)                               # (T_pad*Bp,)

    whh_t = jnp.pad(params["w_hh"].T, ((0, Hp - H), (0, Hp - H))).astype(jnp.bfloat16)
    wfc_t = jnp.pad(params["w_fc"].T, ((0, Hp - H), (0, Op - O))).astype(jnp.bfloat16)
    bfc = jnp.pad(params["b_fc"], (0, Op - O)).reshape(1, Op)

    cost = pl.CostEstimate(
        flops=2 * T_pad * Bp * Hp * Hp + 2 * Bp * Hp * Op,
        transcendentals=T_pad * Bp * Hp,
        bytes_accessed=(tok_flat.size * 4 + p_tbl.size * 4
                        + (whh_t.size + wfc_t.size) * 2 + bfc.size * 4
                        + Bp * (Op + Hp) * 4),
    )

    kernel = functools.partial(rnn_fc_kernel, Bp=Bp, Tt=Tt, T_true=T,
                               needs_mask=(T_pad != T))

    out_p, hn_p = pl.pallas_call(
        kernel,
        out_shape=(jax.ShapeDtypeStruct((Bp, Op), jnp.float32),
                   jax.ShapeDtypeStruct((Bp, Hp), jnp.float32)),
        grid_spec=pltpu.PrefetchScalarGridSpec(
            num_scalar_prefetch=1,            # token ids -> SMEM
            grid=(n_chunks,),
            in_specs=[
                pl.BlockSpec((Vp, Hp), lambda t, tok: (0, 0)),   # fused emb∘W_ih table
                pl.BlockSpec((Hp, Hp), lambda t, tok: (0, 0)),   # W_hh^T (resident)
                pl.BlockSpec((Hp, Op), lambda t, tok: (0, 0)),   # W_fc^T (resident)
                pl.BlockSpec((1, Op), lambda t, tok: (0, 0)),    # fc bias
            ],
            out_specs=(pl.BlockSpec((Bp, Op), lambda t, tok: (0, 0)),
                       pl.BlockSpec((Bp, Hp), lambda t, tok: (0, 0))),
            scratch_shapes=[pltpu.VMEM((Tt * Bp, Hp), jnp.float32),   # staged xproj
                            pltpu.VMEM((Bp, Hp), jnp.float32)],       # carried h
        ),
        compiler_params=pltpu.CompilerParams(
            dimension_semantics=("arbitrary",),   # serial recurrence over T chunks
        ),
        cost_estimate=cost,
    )(tok_flat, p_tbl, whh_t, wfc_t, bfc)

    out = out_p[:B, :O]
    hn = hn_p[:B, :H].reshape(1, B, H)   # nn.RNN returns hn as (num_layers=1, B, H)
    return out, hn


def reference_forward(x_tokens, params):
    """Pure-JAX f32 reference of the PyTorch forward, for a correctness check."""
    embedded = params["embedding"][x_tokens]              # (B, T, E)
    B, T, _ = embedded.shape
    H = params["w_hh"].shape[0]
    h = jnp.zeros((B, H), jnp.float32)
    for t in range(T):
        h = jnp.tanh(embedded[:, t, :] @ params["w_ih"].T
                     + params["b_ih"]
                     + h @ params["w_hh"].T
                     + params["b_hh"])
    out = h @ params["w_fc"].T + params["b_fc"]
    return out, h.reshape(1, B, H)


if __name__ == "__main__":
    # Small shapes consistent with the module (embedding_dim=50, hidden_size=128).
    vocab_size = 16
    embedding_dim = 50
    hidden_size = 128
    output_size = vocab_size
    batch, seq = 2, 8

    key = jax.random.PRNGKey(0)
    k_tok, k_par = jax.random.split(key)
    params = init_params(k_par, vocab_size, embedding_dim, hidden_size, output_size)
    x = jax.random.randint(k_tok, (batch, seq), 0, vocab_size, dtype=jnp.int32)

    out, hn = jax.jit(rnn_model_forward)(x, params)
    jax.block_until_ready((out, hn))

    ref_out, ref_hn = reference_forward(x, params)
    assert out.shape == (batch, output_size)
    assert hn.shape == (1, batch, hidden_size)
    # bf16 MXU operands on the recurrence with f32 accumulation -> loose tolerance.
    assert jnp.allclose(out, ref_out, atol=4e-2, rtol=4e-2), float(jnp.max(jnp.abs(out - ref_out)))
    assert jnp.allclose(hn, ref_hn, atol=4e-2, rtol=4e-2), float(jnp.max(jnp.abs(hn - ref_hn)))

    print("KERNEL_OK")
</pallas_src>

<mosaic_0001>
module attributes {stable_mosaic.version = 11 : i64} {
  func.func @rnn_fc_kernel(%arg0: i32, %arg1: memref<64xi32, #tpu.memory_space<smem>>, %arg2: memref<16x128xf32, #tpu.memory_space<vmem>>, %arg3: memref<128x128xbf16, #tpu.memory_space<vmem>>, %arg4: memref<128x128xbf16, #tpu.memory_space<vmem>>, %arg5: memref<1x128xf32, #tpu.memory_space<vmem>>, %arg6: memref<8x128xf32, #tpu.memory_space<vmem>>, %arg7: memref<8x128xf32, #tpu.memory_space<vmem>>, %arg8: memref<64x128xf32, #tpu.memory_space<vmem>>, %arg9: memref<8x128xf32, #tpu.memory_space<vmem>>) attributes {dimension_semantics = [#tpu.dimension_semantics<arbitrary>], iteration_bounds = array<i64: 1>, scalar_prefetch = 1 : i64, scratch_operands = 2 : i64, tpu.core_type = #tpu.core_type<tc>, window_params = [{pipeline_mode = #tpu.pipeline_mode<synchronous>, transform_indices = @transform_0, window_bounds = array<i64: 16, 128>}, {pipeline_mode = #tpu.pipeline_mode<synchronous>, transform_indices = @transform_1, window_bounds = array<i64: 128, 128>}, {pipeline_mode = #tpu.pipeline_mode<synchronous>, transform_indices = @transform_2, window_bounds = array<i64: 128, 128>}, {pipeline_mode = #tpu.pipeline_mode<synchronous>, transform_indices = @transform_3, window_bounds = array<i64: 1, 128>}, {pipeline_mode = #tpu.pipeline_mode<synchronous>, transform_indices = @transform_4, window_bounds = array<i64: 8, 128>}, {pipeline_mode = #tpu.pipeline_mode<synchronous>, transform_indices = @transform_5, window_bounds = array<i64: 8, 128>}]} {
    %c0_i32 = arith.constant 0 : i32
    %0 = arith.cmpi eq, %arg0, %c0_i32 : i32
    %1 = arith.extui %0 : i1 to i32
    %c0_i32_0 = arith.constant 0 : i32
    %2 = arith.cmpi ne, %1, %c0_i32_0 : i32
    scf.if %2 {
      %cst_36 = arith.constant 0.000000e+00 : f32
      %75 = vector.broadcast %cst_36 : f32 to vector<8x128xf32>
      %c0_37 = arith.constant 0 : index
      %c0_38 = arith.constant 0 : index
      %76 = vector.load %arg9[%c0_37, %c0_38] : memref<8x128xf32, #tpu.memory_space<vmem>>, vector<8x128xf32>
      tpu.vector_store %arg9[%c0_37, %c0_38], %75 {strides = array<i32>} : memref<8x128xf32, #tpu.memory_space<vmem>>, vector<8x128xf32>,
    } else {
    }
    %c64_i32 = arith.constant 64 : i32
    %3 = arith.muli %arg0, %c64_i32 : i32
    %c0_i32_1 = arith.constant 0 : i32
    %c8_i32 = arith.constant 8 : i32
    %4 = arith.addi %c0_i32_1, %c8_i32 : i32
    %c1_i32 = arith.constant 1 : i32
    scf.for %arg10 = %c0_i32_1 to %4 step %c1_i32  : i32 {
      %c1_i32_36 = arith.constant 1 : i32
      %75 = arith.muli %arg10, %c1_i32_36 : i32
      %c0_i32_37 = arith.constant 0 : i32
      %76 = arith.addi %c0_i32_37, %75 : i32
      %c8_i32_38 = arith.constant 8 : i32
      %77 = arith.muli %76, %c8_i32_38 : i32
      %78 = tpu.assume_multiple %77, 8 : i32
      %79 = arith.addi %3, %78 : i32
      %c0_i32_39 = arith.constant 0 : i32
      %80 = arith.addi %79, %c0_i32_39 : i32
      %81 = arith.index_cast %80 : i32 to index
      %82 = memref.load %arg1[%81] : memref<64xi32, #tpu.memory_space<smem>>
      %83 = arith.index_cast %82 : i32 to index
      %c0_40 = arith.constant 0 : index
      %84 = vector.load %arg2[%83, %c0_40] : memref<16x128xf32, #tpu.memory_space<vmem>>, vector<1x128xf32>
      %c0_i32_41 = arith.constant 0 : i32
      %85 = arith.addi %78, %c0_i32_41 : i32
      %86 = arith.index_cast %85 : i32 to index
      %c0_42 = arith.constant 0 : index
      %87 = vector.load %arg8[%86, %c0_42] : memref<64x128xf32, #tpu.memory_space<vmem>>, vector<1x128xf32>
      tpu.vector_store %arg8[%86, %c0_42], %84 {strides = array<i32>} : memref<64x128xf32, #tpu.memory_space<vmem>>, vector<1x128xf32>,
      %88 = arith.addi %3, %78 : i32
      %c1_i32_43 = arith.constant 1 : i32
      %89 = arith.addi %88, %c1_i32_43 : i32
      %90 = arith.index_cast %89 : i32 to index
      %91 = memref.load %arg1[%90] : memref<64xi32, #tpu.memory_space<smem>>
      %92 = arith.index_cast %91 : i32 to index
      %c0_44 = arith.constant 0 : index
      %93 = vector.load %arg2[%92, %c0_44] : memref<16x128xf32, #tpu.memory_space<vmem>>, vector<1x128xf32>
      %c1_i32_45 = arith.constant 1 : i32
      %94 = arith.addi %78, %c1_i32_45 : i32
      %95 = arith.index_cast %94 : i32 to index
      %c0_46 = arith.constant 0 : index
      %96 = vector.load %arg8[%95, %c0_46] : memref<64x128xf32, #tpu.memory_space<vmem>>, vector<1x128xf32>
      tpu.vector_store %arg8[%95, %c0_46], %93 {strides = array<i32>} : memref<64x128xf32, #tpu.memory_space<vmem>>, vector<1x128xf32>,
      %97 = arith.addi %3, %78 : i32
      %c2_i32_47 = arith.constant 2 : i32
      %98 = arith.addi %97, %c2_i32_47 : i32
      %99 = arith.index_cast %98 : i32 to index
      %100 = memref.load %arg1[%99] : memref<64xi32, #tpu.memory_space<smem>>
      %101 = arith.index_cast %100 : i32 to index
      %c0_48 = arith.constant 0 : index
      %102 = vector.load %arg2[%101, %c0_48] : memref<16x128xf32, #tpu.memory_space<vmem>>, vector<1x128xf32>
      %c2_i32_49 = arith.constant 2 : i32
      %103 = arith.addi %78, %c2_i32_49 : i32
      %104 = arith.index_cast %103 : i32 to index
      %c0_50 = arith.constant 0 : index
      %105 = vector.load %arg8[%104, %c0_50] : memref<64x128xf32, #tpu.memory_space<vmem>>, vector<1x128xf32>
      tpu.vector_store %arg8[%104, %c0_50], %102 {strides = array<i32>} : memref<64x128xf32, #tpu.memory_space<vmem>>, vector<1x128xf32>,
      %106 = arith.addi %3, %78 : i32
      %c3_i32_51 = arith.constant 3 : i32
      %107 = arith.addi %106, %c3_i32_51 : i32
      %108 = arith.index_cast %107 : i32 to index
      %109 = memref.load %arg1[%108] : memref<64xi32, #tpu.memory_space<smem>>
      %110 = arith.index_cast %109 : i32 to index
      %c0_52 = arith.constant 0 : index
      %111 = vector.load %arg2[%110, %c0_52] : memref<16x128xf32, #tpu.memory_space<vmem>>, vector<1x128xf32>
      %c3_i32_53 = arith.constant 3 : i32
      %112 = arith.addi %78, %c3_i32_53 : i32
      %113 = arith.index_cast %112 : i32 to index
      %c0_54 = arith.constant 0 : index
      %114 = vector.load %arg8[%113, %c0_54] : memref<64x128xf32, #tpu.memory_space<vmem>>, vector<1x128xf32>
      tpu.vector_store %arg8[%113, %c0_54], %111 {strides = array<i32>} : memref<64x128xf32, #tpu.memory_space<vmem>>, vector<1x128xf32>,
      %115 = arith.addi %3, %78 : i32
      %c4_i32_55 = arith.constant 4 : i32
      %116 = arith.addi %115, %c4_i32_55 : i32
      %117 = arith.index_cast %116 : i32 to index
      %118 = memref.load %arg1[%117] : memref<64xi32, #tpu.memory_space<smem>>
      %119 = arith.index_cast %118 : i32 to index
      %c0_56 = arith.constant 0 : index
      %120 = vector.load %arg2[%119, %c0_56] : memref<16x128xf32, #tpu.memory_space<vmem>>, vector<1x128xf32>
      %c4_i32_57 = arith.constant 4 : i32
      %121 = arith.addi %78, %c4_i32_57 : i32
      %122 = arith.index_cast %121 : i32 to index
      %c0_58 = arith.constant 0 : index
      %123 = vector.load %arg8[%122, %c0_58] : memref<64x128xf32, #tpu.memory_space<vmem>>, vector<1x128xf32>
      tpu.vector_store %arg8[%122, %c0_58], %120 {strides = array<i32>} : memref<64x128xf32, #tpu.memory_space<vmem>>, vector<1x128xf32>,
      %124 = arith.addi %3, %78 : i32
      %c5_i32_59 = arith.constant 5 : i32
      %125 = arith.addi %124, %c5_i32_59 : i32
      %126 = arith.index_cast %125 : i32 to index
      %127 = memref.load %arg1[%126] : memref<64xi32, #tpu.memory_space<smem>>
      %128 = arith.index_cast %127 : i32 to index
      %c0_60 = arith.constant 0 : index
      %129 = vector.load %arg2[%128, %c0_60] : memref<16x128xf32, #tpu.memory_space<vmem>>, vector<1x128xf32>
      %c5_i32_61 = arith.constant 5 : i32
      %130 = arith.addi %78, %c5_i32_61 : i32
      %131 = arith.index_cast %130 : i32 to index
      %c0_62 = arith.constant 0 : index
      %132 = vector.load %arg8[%131, %c0_62] : memref<64x128xf32, #tpu.memory_space<vmem>>, vector<1x128xf32>
      tpu.vector_store %arg8[%131, %c0_62], %129 {strides = array<i32>} : memref<64x128xf32, #tpu.memory_space<vmem>>, vector<1x128xf32>,
      %133 = arith.addi %3, %78 : i32
      %c6_i32_63 = arith.constant 6 : i32
      %134 = arith.addi %133, %c6_i32_63 : i32
      %135 = arith.index_cast %134 : i32 to index
      %136 = memref.load %arg1[%135] : memref<64xi32, #tpu.memory_space<smem>>
      %137 = arith.index_cast %136 : i32 to index
      %c0_64 = arith.constant 0 : index
      %138 = vector.load %arg2[%137, %c0_64] : memref<16x128xf32, #tpu.memory_space<vmem>>, vector<1x128xf32>
      %c6_i32_65 = arith.constant 6 : i32
      %139 = arith.addi %78, %c6_i32_65 : i32
      %140 = arith.index_cast %139 : i32 to index
      %c0_66 = arith.constant 0 : index
      %141 = vector.load %arg8[%140, %c0_66] : memref<64x128xf32, #tpu.memory_space<vmem>>, vector<1x128xf32>
      tpu.vector_store %arg8[%140, %c0_66], %138 {strides = array<i32>} : memref<64x128xf32, #tpu.memory_space<vmem>>, vector<1x128xf32>,
      %142 = arith.addi %3, %78 : i32
      %c7_i32_67 = arith.constant 7 : i32
      %143 = arith.addi %142, %c7_i32_67 : i32
      %144 = arith.index_cast %143 : i32 to index
      %145 = memref.load %arg1[%144] : memref<64xi32, #tpu.memory_space<smem>>
      %146 = arith.index_cast %145 : i32 to index
      %c0_68 = arith.constant 0 : index
      %147 = vector.load %arg2[%146, %c0_68] : memref<16x128xf32, #tpu.memory_space<vmem>>, vector<1x128xf32>
      %c7_i32_69 = arith.constant 7 : i32
      %148 = arith.addi %78, %c7_i32_69 : i32
      %149 = arith.index_cast %148 : i32 to index
      %c0_70 = arith.constant 0 : index
      %150 = vector.load %arg8[%149, %c0_70] : memref<64x128xf32, #tpu.memory_space<vmem>>, vector<1x128xf32>
      tpu.vector_store %arg8[%149, %c0_70], %147 {strides = array<i32>} : memref<64x128xf32, #tpu.memory_space<vmem>>, vector<1x128xf32>,
    }
    %c8_i32_2 = arith.constant 8 : i32
    %c0 = arith.constant 0 : index
    %c0_3 = arith.constant 0 : index
    %5 = vector.load %arg3[%c0, %c0_3] : memref<128x128xbf16, #tpu.memory_space<vmem>>, vector<128x128xbf16>
    %c0_4 = arith.constant 0 : index
    %c0_5 = arith.constant 0 : index
    %6 = vector.load %arg9[%c0_4, %c0_5] : memref<8x128xf32, #tpu.memory_space<vmem>>, vector<8x128xf32>
    %c0_i32_6 = arith.constant 0 : i32
    %7 = arith.truncf %6 : vector<8x128xf32> to vector<8x128xbf16>
    %cst = arith.constant dense<0.000000e+00> : vector<8x128xf32>
    %8 = tpu.matmul %7, %5, %cst {dimension_numbers = #tpu.dot_dimension_numbers<[1], [0], [0], [1], [0, 0, 1, 1], [], []>} : vector<8x128xbf16>, vector<128x128xbf16>, vector<8x128xf32> -> vector<8x128xf32>
    %c8_i32_7 = arith.constant 8 : i32
    %9 = arith.muli %c0_i32_6, %c8_i32_7 : i32
    %10 = tpu.assume_multiple %9, 8 : i32
    %11 = arith.index_cast %10 : i32 to index
    %c0_8 = arith.constant 0 : index
    %12 = vector.load %arg8[%11, %c0_8] : memref<64x128xf32, #tpu.memory_space<vmem>>, vector<8x128xf32>
    %13 = arith.addf %12, %8 : vector<8x128xf32>
    %14 = math.tanh %13 : vector<8x128xf32>
    %c1_i32_9 = arith.constant 1 : i32
    %15 = arith.truncf %14 : vector<8x128xf32> to vector<8x128xbf16>
    %cst_10 = arith.constant dense<0.000000e+00> : vector<8x128xf32>
    %16 = tpu.matmul %15, %5, %cst_10 {dimension_numbers = #tpu.dot_dimension_numbers<[1], [0], [0], [1], [0, 0, 1, 1], [], []>} : vector<8x128xbf16>, vector<128x128xbf16>, vector<8x128xf32> -> vector<8x128xf32>
    %c8_i32_11 = arith.constant 8 : i32
    %17 = arith.muli %c1_i32_9, %c8_i32_11 : i32
    %18 = tpu.assume_multiple %17, 8 : i32
    %19 = arith.index_cast %18 : i32 to index
    %c0_12 = arith.constant 0 : index
    %20 = vector.load %arg8[%19, %c0_12] : memref<64x128xf32, #tpu.memory_space<vmem>>, vector<8x128xf32>
    %21 = arith.addf %20, %16 : vector<8x128xf32>
    %22 = math.tanh %21 : vector<8x128xf32>
    %c2_i32 = arith.constant 2 : i32
    %23 = arith.truncf %22 : vector<8x128xf32> to vector<8x128xbf16>
    %cst_13 = arith.constant dense<0.000000e+00> : vector<8x128xf32>
    %24 = tpu.matmul %23, %5, %cst_13 {dimension_numbers = #tpu.dot_dimension_numbers<[1], [0], [0], [1], [0, 0, 1, 1], [], []>} : vector<8x128xbf16>, vector<128x128xbf16>, vector<8x128xf32> -> vector<8x128xf32>
    %c8_i32_14 = arith.constant 8 : i32
    %25 = arith.muli %c2_i32, %c8_i32_14 : i32
    %26 = tpu.assume_multiple %25, 8 : i32
    %27 = arith.index_cast %26 : i32 to index
    %c0_15 = arith.constant 0 : index
    %28 = vector.load %arg8[%27, %c0_15] : memref<64x128xf32, #tpu.memory_space<vmem>>, vector<8x128xf32>
    %29 = arith.addf %28, %24 : vector<8x128xf32>
    %30 = math.tanh %29 : vector<8x128xf32>
    %c3_i32 = arith.constant 3 : i32
    %31 = arith.truncf %30 : vector<8x128xf32> to vector<8x128xbf16>
    %cst_16 = arith.constant dense<0.000000e+00> : vector<8x128xf32>
    %32 = tpu.matmul %31, %5, %cst_16 {dimension_numbers = #tpu.dot_dimension_numbers<[1], [0], [0], [1], [0, 0, 1, 1], [], []>} : vector<8x128xbf16>, vector<128x128xbf16>, vector<8x128xf32> -> vector<8x128xf32>
    %c8_i32_17 = arith.constant 8 : i32
    %33 = arith.muli %c3_i32, %c8_i32_17 : i32
    %34 = tpu.assume_multiple %33, 8 : i32
    %35 = arith.index_cast %34 : i32 to index
    %c0_18 = arith.constant 0 : index
    %36 = vector.load %arg8[%35, %c0_18] : memref<64x128xf32, #tpu.memory_space<vmem>>, vector<8x128xf32>
    %37 = arith.addf %36, %32 : vector<8x128xf32>
    %38 = math.tanh %37 : vector<8x128xf32>
    %c4_i32 = arith.constant 4 : i32
    %39 = arith.truncf %38 : vector<8x128xf32> to vector<8x128xbf16>
    %cst_19 = arith.constant dense<0.000000e+00> : vector<8x128xf32>
    %40 = tpu.matmul %39, %5, %cst_19 {dimension_numbers = #tpu.dot_dimension_numbers<[1], [0], [0], [1], [0, 0, 1, 1], [], []>} : vector<8x128xbf16>, vector<128x128xbf16>, vector<8x128xf32> -> vector<8x128xf32>
    %c8_i32_20 = arith.constant 8 : i32
    %41 = arith.muli %c4_i32, %c8_i32_20 : i32
    %42 = tpu.assume_multiple %41, 8 : i32
    %43 = arith.index_cast %42 : i32 to index
    %c0_21 = arith.constant 0 : index
    %44 = vector.load %arg8[%43, %c0_21] : memref<64x128xf32, #tpu.memory_space<vmem>>, vector<8x128xf32>
    %45 = arith.addf %44, %40 : vector<8x128xf32>
    %46 = math.tanh %45 : vector<8x128xf32>
    %c5_i32 = arith.constant 5 : i32
    %47 = arith.truncf %46 : vector<8x128xf32> to vector<8x128xbf16>
    %cst_22 = arith.constant dense<0.000000e+00> : vector<8x128xf32>
    %48 = tpu.matmul %47, %5, %cst_22 {dimension_numbers = #tpu.dot_dimension_numbers<[1], [0], [0], [1], [0, 0, 1, 1], [], []>} : vector<8x128xbf16>, vector<128x128xbf16>, vector<8x128xf32> -> vector<8x128xf32>
    %c8_i32_23 = arith.constant 8 : i32
    %49 = arith.muli %c5_i32, %c8_i32_23 : i32
    %50 = tpu.assume_multiple %49, 8 : i32
    %51 = arith.index_cast %50 : i32 to index
    %c0_24 = arith.constant 0 : index
    %52 = vector.load %arg8[%51, %c0_24] : memref<64x128xf32, #tpu.memory_space<vmem>>, vector<8x128xf32>
    %53 = arith.addf %52, %48 : vector<8x128xf32>
    %54 = math.tanh %53 : vector<8x128xf32>
    %c6_i32 = arith.constant 6 : i32
    %55 = arith.truncf %54 : vector<8x128xf32> to vector<8x128xbf16>
    %cst_25 = arith.constant dense<0.000000e+00> : vector<8x128xf32>
    %56 = tpu.matmul %55, %5, %cst_25 {dimension_numbers = #tpu.dot_dimension_numbers<[1], [0], [0], [1], [0, 0, 1, 1], [], []>} : vector<8x128xbf16>, vector<128x128xbf16>, vector<8x128xf32> -> vector<8x128xf32>
    %c8_i32_26 = arith.constant 8 : i32
    %57 = arith.muli %c6_i32, %c8_i32_26 : i32
    %58 = tpu.assume_multiple %57, 8 : i32
    %59 = arith.index_cast %58 : i32 to index
    %c0_27 = arith.constant 0 : index
    %60 = vector.load %arg8[%59, %c0_27] : memref<64x128xf32, #tpu.memory_space<vmem>>, vector<8x128xf32>
    %61 = arith.addf %60, %56 : vector<8x128xf32>
    %62 = math.tanh %61 : vector<8x128xf32>
    %c7_i32 = arith.constant 7 : i32
    %63 = arith.truncf %62 : vector<8x128xf32> to vector<8x128xbf16>
    %cst_28 = arith.constant dense<0.000000e+00> : vector<8x128xf32>
    %64 = tpu.matmul %63, %5, %cst_28 {dimension_numbers = #tpu.dot_dimension_numbers<[1], [0], [0], [1], [0, 0, 1, 1], [], []>} : vector<8x128xbf16>, vector<128x128xbf16>, vector<8x128xf32> -> vector<8x128xf32>
    %c8_i32_29 = arith.constant 8 : i32
    %65 = arith.muli %c7_i32, %c8_i32_29 : i32
    %66 = tpu.assume_multiple %65, 8 : i32
    %67 = arith.index_cast %66 : i32 to index
    %c0_30 = arith.constant 0 : index
    %68 = vector.load %arg8[%67, %c0_30] : memref<64x128xf32, #tpu.memory_space<vmem>>, vector<8x128xf32>
    %69 = arith.addf %68, %64 : vector<8x128xf32>
    %70 = math.tanh %69 : vector<8x128xf32>
    %c8_i32_31 = arith.constant 8 : i32
    %c0_32 = arith.constant 0 : index
    %c0_33 = arith.constant 0 : index
    %71 = vector.load %arg9[%c0_32, %c0_33] : memref<8x128xf32, #tpu.memory_space<vmem>>, vector<8x128xf32>
    tpu.vector_store %arg9[%c0_32, %c0_33], %70 {strides = array<i32>} : memref<8x128xf32, #tpu.memory_space<vmem>>, vector<8x128xf32>,
    %c0_i32_34 = arith.constant 0 : i32
    %72 = arith.cmpi eq, %arg0, %c0_i32_34 : i32
    %73 = arith.extui %72 : i1 to i32
    %c0_i32_35 = arith.constant 0 : i32
    %74 = arith.cmpi ne, %73, %c0_i32_35 : i32
    scf.if %74 {
      %c0_36 = arith.constant 0 : index
      %c0_37 = arith.constant 0 : index
      %75 = vector.load %arg7[%c0_36, %c0_37] : memref<8x128xf32, #tpu.memory_space<vmem>>, vector<8x128xf32>
      tpu.vector_store %arg7[%c0_36, %c0_37], %70 {strides = array<i32>} : memref<8x128xf32, #tpu.memory_space<vmem>>, vector<8x128xf32>,
      %76 = arith.truncf %70 : vector<8x128xf32> to vector<8x128xbf16>
      %c0_38 = arith.constant 0 : index
      %c0_39 = arith.constant 0 : index
      %77 = vector.load %arg4[%c0_38, %c0_39] : memref<128x128xbf16, #tpu.memory_space<vmem>>, vector<128x128xbf16>
      %cst_40 = arith.constant dense<0.000000e+00> : vector<8x128xf32>
      %78 = tpu.matmul %76, %77, %cst_40 {dimension_numbers = #tpu.dot_dimension_numbers<[1], [0], [0], [1], [0, 0, 1, 1], [], []>} : vector<8x128xbf16>, vector<128x128xbf16>, vector<8x128xf32> -> vector<8x128xf32>
      %c0_41 = arith.constant 0 : index
      %c0_42 = arith.constant 0 : index
      %79 = vector.load %arg5[%c0_41, %c0_42] : memref<1x128xf32, #tpu.memory_space<vmem>>, vector<1x128xf32>
      %80 = vector.broadcast %79 : vector<1x128xf32> to vector<8x128xf32>
      %81 = arith.addf %78, %80 : vector<8x128xf32>
      %c0_43 = arith.constant 0 : index
      %c0_44 = arith.constant 0 : index
      %82 = vector.load %arg6[%c0_43, %c0_44] : memref<8x128xf32, #tpu.memory_space<vmem>>, vector<8x128xf32>
      tpu.vector_store %arg6[%c0_43, %c0_44], %81 {strides = array<i32>} : memref<8x128xf32, #tpu.memory_space<vmem>>, vector<8x128xf32>,
    } else {
    }
    return
  }
  func.func @transform_0(%arg0: i32, %arg1: memref<64xi32, #tpu.memory_space<smem>>) -> (i32, i32) {
    %c0_i32 = arith.constant 0 : i32
    %c0_i32_0 = arith.constant 0 : i32
    %c0_i32_1 = arith.constant 0 : i32
    return %c0_i32, %c0_i32_0 : i32, i32
  }
  func.func @transform_1(%arg0: i32, %arg1: memref<64xi32, #tpu.memory_space<smem>>) -> (i32, i32) {
    %c0_i32 = arith.constant 0 : i32
    %c0_i32_0 = arith.constant 0 : i32
    %c0_i32_1 = arith.constant 0 : i32
    return %c0_i32, %c0_i32_0 : i32, i32
  }
  func.func @transform_2(%arg0: i32, %arg1: memref<64xi32, #tpu.memory_space<smem>>) -> (i32, i32) {
    %c0_i32 = arith.constant 0 : i32
    %c0_i32_0 = arith.constant 0 : i32
    %c0_i32_1 = arith.constant 0 : i32
    return %c0_i32, %c0_i32_0 : i32, i32
  }
  func.func @transform_3(%arg0: i32, %arg1: memref<64xi32, #tpu.memory_space<smem>>) -> (i32, i32) {
    %c0_i32 = arith.constant 0 : i32
    %c0_i32_0 = arith.constant 0 : i32
    %c0_i32_1 = arith.constant 0 : i32
    return %c0_i32, %c0_i32_0 : i32, i32
  }
  func.func @transform_4(%arg0: i32, %arg1: memref<64xi32, #tpu.memory_space<smem>>) -> (i32, i32) {
    %c0_i32 = arith.constant 0 : i32
    %c0_i32_0 = arith.constant 0 : i32
    %c0_i32_1 = arith.constant 0 : i32
    return %c0_i32, %c0_i32_0 : i32, i32
  }
  func.func @transform_5(%arg0: i32, %arg1: memref<64xi32, #tpu.memory_space<smem>>) -> (i32, i32) {
    %c0_i32 = arith.constant 0 : i32
    %c0_i32_0 = arith.constant 0 : i32
    %c0_i32_1 = arith.constant 0 : i32
    return %c0_i32, %c0_i32_0 : i32, i32
  }
}

</mosaic_0001>

<bundles_post_ra>
// kernel: rnn_model_forward.1
= control target key start
LH: loop header
LB: loop body
LE: loop exit
PB: predicated region body
PF: predicated region fallthrough
CT: control target
= control target key end

     0   :  { %s1341_s0 = inlined_call_operand.vmem [shape: s32[64], index: 0, kind: input, shape index: {}]   ;;  %s1342_s1 = inlined_call_operand.vmem [shape: f32[16,128], index: 1, kind: input, shape index: {}]   ;;  %s1343_s2 = inlined_call_operand.vmem [shape: bf16[128,128], index: 2, kind: input, shape index: {}]   ;;  %s1344_s3 = inlined_call_operand.vmem [shape: bf16[128,128], index: 3, kind: input, shape index: {}]   ;;  %s1345_s4 = inlined_call_operand.vmem [shape: f32[1,128], index: 4, kind: input, shape index: {}]   ;;  %s1346_s5 = inlined_call_operand.vmem [shape: f32[8,128], index: 5, kind: output, shape index: {0}]   ;;  %s1347_s6 = inlined_call_operand.vmem [shape: f32[8,128], index: 6, kind: output, shape index: {1}]  }
   0x1   :  { %s12_s23 = sshll.u32 %s1341_s0, 4  ;;  %s13_s23 = int_to_ptr.vmem [resolvable:$true] %s12_s23 }
   0x2   :  { %s1017_s24 = scalar_lea.vmem %s13_s23, 16  ;;  %p1022_p1 = scmp.lt.s32.totalorder %s13_s23, %s13_s23 }
   0x3   :  { %p1018_p0 = scmp.ne.s32.totalorder %s13_s23, %s1017_s24  ;;  %p1023_p2 = scmp.lt.s32.totalorder %s1017_s24, %s1017_s24 }
   0x5   :  { %p1024_p3 = por %p1023_p2, %p1022_p1 }
   0x7   :  { %p1025_p4 = pnand %p1024_p3, %p1018_p0 }
   0x9   :  { %1028 = shalt.err (!%p1025_p4)  }
   0xa   :  { %s1039_s25 = smov [#allocation5]  }
   0xb   :  { %15 = dma.vmem_to_smem %s13_s23, 16, %s1039_s25, [#allocation4] }
   0xc   :  { %1033 = dma.done.wait [#allocation4], 16 }
   0xd   :  { %1034 = vsyncadd [#allocation4], 4294967280 }
   0xe   :  { %17 = sfence }
   0xf   :  { %v1040_v0 = vmov 0.0   ;;  %s1081_s26 = smov 0  }
  0x10   :  { %31 = vst [vmem:[#allocation3] sm:$0xff] %v1040_v0 }
  0x11 LB: > { %s681_s0 = sshll.u32 %s1037_s26, 3  ;;  %s38_s26 = sadd.s32 1, %s1037_s26   ;;  %s1037_s26 = sphi %s1081_s26, %s38_s26  }
  0x12   : > { %s41_s27 = sld [smem:[#allocation5 + %s681_s0]]  ;;  %s46_s28 = sadd.s32 1, %s681_s0 }
  0x13   : > { %s53_s29 = sadd.s32 2, %s681_s0  ;;  %s47_s30 = sld [smem:[#allocation5 + %s46_s28]] }
  0x14   : > { %s54_s7 = sld [smem:[#allocation5 + %s53_s29]]  ;;  %s60_s8 = sadd.s32 3, %s681_s0 }
  0x15   : > { %s67_s9 = sadd.s32 4, %s681_s0  ;;  %s61_s10 = sld [smem:[#allocation5 + %s60_s8]] }
  0x16   : > { %s68_s11 = sld [smem:[#allocation5 + %s67_s9]]  ;;  %s74_s12 = sadd.s32 5, %s681_s0 }
  0x17   : > { %s81_s13 = sadd.s32 6, %s681_s0  ;;  %s75_s17 = sld [smem:[#allocation5 + %s74_s12]] }
  0x18   : > { %s42_s16 = scalar_lea.vmem %s1342_s1, %s41_s27  ;;  %s82_s18 = sld [smem:[#allocation5 + %s81_s13]] }
  0x19   : > { %v43_v1 = vld [vmem:[%s42_s16] sm:$0x1]  ;;  %s88_s19 = sadd.s32 7, %s681_s0  ;;  %s44_s20 = scalar_lea.vmem [#allocation2], %s681_s0 }
  0x1a   : > { %45 = vst [vmem:[%s44_s20] sm:$0x1] %v43_v1  ;;  %s48_s23 = scalar_lea.vmem %s1342_s1, %s47_s30  ;;  %s55_s28 = scalar_lea.vmem %s1342_s1, %s54_s7 }
  0x1b   : > { %v49_v2 = vld [vmem:[%s48_s23] sm:$0x1]  ;;  %s89_s29 = sld [smem:[#allocation5 + %s88_s19]]  ;;  %s62_s9 = scalar_lea.vmem %s1342_s1, %s61_s10 }
  0x1c   : > { %v56_v3 = vld [vmem:[%s55_s28] sm:$0x1]  ;;  %683 = vst [vmem:[%s44_s20 + $0x1] sm:$0x1] %v49_v2  ;;  %s69_s13 = scalar_lea.vmem %s1342_s1, %s68_s11  ;;  %p35_p5 = scmp.ge.s32.totalorder %s38_s26, 8  }
  0x1d   : > { %685 = vst [vmem:[%s44_s20 + $0x2] sm:$0x1] %v56_v3  ;;  %v63_v4 = vld [vmem:[%s62_s9] sm:$0x1]  ;;  %s76_s7 = scalar_lea.vmem %s1342_s1, %s75_s17  ;;  %794 = vmatprep.subr.bf16.mxu0 (%p35_p5), %v1040_v0  ;;  %814 = vmatprep.subr.bf16.mxu1 (%p35_p5), %v1040_v0  ;;  %vm1041_vm0 = vmmov (%p35_p5), 0   ;;  %v1129_v10 = vld [vmem:[%s1343_s2 + $0x8] sm:$0xff] (%p35_p5)  }
  0x1e   : > { %v70_v5 = vld [vmem:[%s69_s13] sm:$0x1]  ;;  %687 = vst [vmem:[%s44_s20 + $0x3] sm:$0x1] %v63_v4  ;;  %s83_s19 = scalar_lea.vmem %s1342_s1, %s82_s18  ;;  %37 = sbr.rel (!%p35_p5) target bundleno = 17 (0x11), region = 82  ;;  %810 = vmatprep.mubr.msk.bf16.mxu0 (%p35_p5), %vm1041_vm0, %v1040_v0  ;;  %830 = vmatprep.mubr.msk.bf16.mxu1 (%p35_p5), %vm1041_vm0, %v1040_v0  ;;  %v1138_v11 = vld [vmem:[%s1343_s2 + $0x10] sm:$0xff] (%p35_p5)  }
  0x1f   : > { %689 = vst [vmem:[%s44_s20 + $0x4] sm:$0x1] %v70_v5  ;;  %v77_v6 = vld [vmem:[%s76_s7] sm:$0x1]  ;;  %v1146_v12 = vld [vmem:[%s1343_s2 + $0x18] sm:$0xff] (%p35_p5)   ;;  %v1165_v14 = vld [vmem:[%s1343_s2 + $0x28] sm:$0xff] (%p35_p5)  }
  0x20   : > { %691 = vst [vmem:[%s44_s20 + $0x5] sm:$0x1] %v77_v6  ;;  %v84_v7 = vld [vmem:[%s83_s19] sm:$0x1]  ;;  %v1174_v15 = vld [vmem:[%s1343_s2 + $0x30] sm:$0xff] (%p35_p5)   ;;  %v1183_v16 = vld [vmem:[%s1343_s2 + $0x38] sm:$0xff] (%p35_p5)  }
  0x21   : > { %693 = vst [vmem:[%s44_s20 + $0x6] sm:$0x1] %v84_v7  ;;  %s90_s11 = scalar_lea.vmem %s1342_s1, %s89_s29  ;;  %v1118_v9 = vld [vmem:[%s1343_s2] sm:$0xff] (%p35_p5)   ;;  %v994_v5 = vld [vmem:[%s1344_s3 + $0x8] sm:$0xff] (%p35_p5)   ;;  %v995_v6 = vld [vmem:[%s1344_s3 + $0x10] sm:$0xff] (%p35_p5)  }
  0x22   : > { %v91_v8 = vld [vmem:[%s90_s11] sm:$0x1]  ;;  %795 = vmatpush3.bf16.msra.mxu0 (%p35_p5), %v1118_v9  ;;  %815 = vmatpush3.bf16.msra.mxu1 (%p35_p5), %v1118_v9  ;;  %v996_v7 = vld [vmem:[%s1344_s3 + $0x18] sm:$0xff] (%p35_p5)  }
  0x23   : > { %695 = vst [vmem:[%s44_s20 + $0x7] sm:$0x1] %v91_v8  ;;  %796 = vmatprep.subr.bf16.mxu0 (%p35_p5), %v1040_v0  ;;  %816 = vmatprep.subr.bf16.mxu1 (%p35_p5), %v1040_v0  ;;  %v1156_v13 = vld [vmem:[%s1343_s2 + $0x20] sm:$0xff] (%p35_p5)  }
  0x24   :  { %v111_v17 = vld [vmem:[#allocation3] sm:$0xff] (%p35_p5) }
  0x25   :  { %v112_v18 = vpack.c.bf16 %v111_v17, %v111_v17  ;;  %v993_v4 = vld [vmem:[%s1344_s3] sm:$0xff]   ;;  %v998_v17 = vld [vmem:[%s1344_s3 + $0x28] sm:$0xff]  }
  0x26   :  { %797 = vmatpush3.bf16.msra.mxu0 %v1129_v10  ;;  %817 = vmatpush3.bf16.msra.mxu1 %v1129_v10 }
  0x27   :  { %798 = vmatprep.subr.bf16.mxu0 %v1040_v0  ;;  %818 = vmatprep.subr.bf16.mxu1 %v1040_v0 }
  0x2a   :  { %799 = vmatpush3.bf16.msra.mxu0 %v1138_v11  ;;  %819 = vmatpush3.bf16.msra.mxu1 %v1138_v11  ;;  %v201_v19 = vld [vmem:[#allocation2] sm:$0xff]  ;;  %v246_v27 = vld [vmem:[#allocation2 + $0x8] sm:$0xff]  ;;  %v291_v35 = vld [vmem:[#allocation2 + $0x10] sm:$0xff] }
  0x2b   :  { %800 = vmatprep.subr.bf16.mxu0 %v1040_v0  ;;  %820 = vmatprep.subr.bf16.mxu1 %v1040_v0  ;;  %v336_v43 = vld [vmem:[#allocation2 + $0x18] sm:$0xff]  ;;  %v381_v51 = vld [vmem:[#allocation2 + $0x20] sm:$0xff]  ;;  %v426_v59 = vld [vmem:[#allocation2 + $0x28] sm:$0xff] }
  0x2c   :  { %v471_v8 = vld [vmem:[#allocation2 + $0x30] sm:$0xff] }
  0x2e   :  { %801 = vmatpush3.bf16.msra.mxu0 %v1146_v12  ;;  %821 = vmatpush3.bf16.msra.mxu1 %v1146_v12 }
  0x2f   :  { %802 = vmatprep.subr.bf16.mxu0 %v1040_v0  ;;  %822 = vmatprep.subr.bf16.mxu1 %v1040_v0 }
  0x32   :  { %803 = vmatpush3.bf16.msra.mxu0 %v1156_v13  ;;  %823 = vmatpush3.bf16.msra.mxu1 %v1156_v13 }
  0x33   :  { %804 = vmatprep.subr.bf16.mxu0 %v1040_v0  ;;  %824 = vmatprep.subr.bf16.mxu1 %v1040_v0 }
  0x36   :  { %805 = vmatpush3.bf16.msra.mxu0 %v1165_v14  ;;  %825 = vmatpush3.bf16.msra.mxu1 %v1165_v14 }
  0x37   :  { %806 = vmatprep.subr.bf16.mxu0 %v1040_v0  ;;  %826 = vmatprep.subr.bf16.mxu1 %v1040_v0 }
  0x3a   :  { %807 = vmatpush3.bf16.msra.mxu0 %v1174_v15  ;;  %827 = vmatpush3.bf16.msra.mxu1 %v1174_v15 }
  0x3b   :  { %808 = vmatprep.subr.bf16.mxu0 %v1040_v0  ;;  %828 = vmatprep.subr.bf16.mxu1 %v1040_v0 }
  0x3e   :  { %809 = vmatpush3.bf16.msra.mxu0 %v1183_v16  ;;  %829 = vmatpush3.bf16.msra.mxu1 %v1183_v16 }
  0x3f   :  { %834 = vmatprep.subr.bf16.mxu0 %v1040_v0  ;;  %854 = vmatprep.subr.bf16.mxu1 %v1040_v0 }
  0x41   :  { %811 = vmatmul.mubr.bf16.vlgmr.msra.gmra.mrb[0].mxu0 %v112_v18  ;;  %v999_v18 = vld [vmem:[%s1344_s3 + $0x30] sm:$0xff]  }
  0x42   :  { %835 = vmatpush3.bf16.msra.mxu0 %v1118_v9  ;;  %850 = vmatprep.mubr.msk.bf16.mxu0 %vm1041_vm0, %v1040_v0 }
  0x43   :  { %836 = vmatprep.subr.bf16.mxu0 %v1040_v0 }
  0x46   :  { %837 = vmatpush3.bf16.msra.mxu0 %v1129_v10 }
  0x47   :  { %838 = vmatprep.subr.bf16.mxu0 %v1040_v0 }
  0x4a   :  { %839 = vmatpush3.bf16.msra.mxu0 %v1138_v11 }
  0x4b   :  { %840 = vmatprep.subr.bf16.mxu0 %v1040_v0 }
  0x4e   :  { %841 = vmatpush3.bf16.msra.mxu0 %v1146_v12 }
  0x4f   :  { %842 = vmatprep.subr.bf16.mxu0 %v1040_v0 }
  0x52   :  { %843 = vmatpush3.bf16.msra.mxu0 %v1156_v13 }
  0x53   :  { %844 = vmatprep.subr.bf16.mxu0 %v1040_v0 }
  0x56   :  { %845 = vmatpush3.bf16.msra.mxu0 %v1165_v14 }
  0x57   :  { %846 = vmatprep.subr.bf16.mxu0 %v1040_v0 }
  0x5a   :  { %847 = vmatpush3.bf16.msra.mxu0 %v1174_v15 }
  0x5b   :  { %848 = vmatprep.subr.bf16.mxu0 %v1040_v0 }
  0x5e   :  { %849 = vmatpush3.bf16.msra.mxu0 %v1183_v16 }
  0x5f   :  { %874 = vmatprep.subr.bf16.mxu0 %v1040_v0 }
 0x114   :  { %v195_v20 = vpop.f32.mrb[0].mxu0 }
 0x115   :  { %v202_v21 = vadd.f32 %v201_v19, %v195_v20  ;;  %v812_v22 = vpop.f32.mrb[1].mxu0  ;;  %v1000_v19 = vld [vmem:[%s1344_s3 + $0x38] sm:$0xff]  }
 0x116   :  { %v198_v23 = vpop.f32.mrb[2].mxu0  ;;  %v516_v20 = vld [vmem:[#allocation2 + $0x38] sm:$0xff] }
 0x117   :  { %1001 = vtanh.f32 %v202_v21  ;;  %v813_v24 = vpop.f32.mrb[3].mxu0 }
 0x121   :  { %v1002_v25 = vpop.eup %1001 }
 0x122   :  { %v204_v26 = vpack.c.bf16 %v1002_v25, %v1002_v25 }
 0x124   :  { %831 = vmatmul.mubr.bf16.vlgmr.msra.gmra.mrb[0].mxu1 %v204_v26 }
 0x125   :  { %855 = vmatpush3.bf16.msra.mxu1 %v1118_v9  ;;  %870 = vmatprep.mubr.msk.bf16.mxu1 %vm1041_vm0, %v1040_v0 }
 0x126   :  { %856 = vmatprep.subr.bf16.mxu1 %v1040_v0 }
 0x129   :  { %857 = vmatpush3.bf16.msra.mxu1 %v1129_v10 }
 0x12a   :  { %858 = vmatprep.subr.bf16.mxu1 %v1040_v0 }
 0x12d   :  { %859 = vmatpush3.bf16.msra.mxu1 %v1138_v11 }
 0x12e   :  { %860 = vmatprep.subr.bf16.mxu1 %v1040_v0 }
 0x131   :  { %861 = vmatpush3.bf16.msra.mxu1 %v1146_v12 }
 0x132   :  { %862 = vmatprep.subr.bf16.mxu1 %v1040_v0 }
 0x135   :  { %863 = vmatpush3.bf16.msra.mxu1 %v1156_v13 }
 0x136   :  { %864 = vmatprep.subr.bf16.mxu1 %v1040_v0 }
 0x139   :  { %865 = vmatpush3.bf16.msra.mxu1 %v1165_v14 }
 0x13a   :  { %866 = vmatprep.subr.bf16.mxu1 %v1040_v0 }
 0x13d   :  { %867 = vmatpush3.bf16.msra.mxu1 %v1174_v15 }
 0x13e   :  { %868 = vmatprep.subr.bf16.mxu1 %v1040_v0 }
 0x141   :  { %869 = vmatpush3.bf16.msra.mxu1 %v1183_v16 }
 0x142   :  { %894 = vmatprep.subr.bf16.mxu1 %v1040_v0 }
 0x1f7   :  { %v239_v28 = vpop.f32.mrb[0].mxu1 }
 0x1f8   :  { %v247_v29 = vadd.f32 %v246_v27, %v239_v28  ;;  %v832_v30 = vpop.f32.mrb[1].mxu1 }
 0x1f9   :  { %v242_v31 = vpop.f32.mrb[2].mxu1 }
 0x1fa   :  { %1003 = vtanh.f32 %v247_v29  ;;  %v833_v32 = vpop.f32.mrb[3].mxu1 }
 0x204   :  { %v1004_v33 = vpop.eup %1003 }
 0x205   :  { %v249_v34 = vpack.c.bf16 %v1004_v33, %v1004_v33 }
 0x207   :  { %851 = vmatmul.mubr.bf16.vlgmr.msra.gmra.mrb[4].mxu0 %v249_v34 }
 0x208   :  { %875 = vmatpush3.bf16.msra.mxu0 %v1118_v9  ;;  %890 = vmatprep.mubr.msk.bf16.mxu0 %vm1041_vm0, %v1040_v0 }
 0x209   :  { %876 = vmatprep.subr.bf16.mxu0 %v1040_v0 }
 0x20c   :  { %877 = vmatpush3.bf16.msra.mxu0 %v1129_v10 }
 0x20d   :  { %878 = vmatprep.subr.bf16.mxu0 %v1040_v0 }
 0x210   :  { %879 = vmatpush3.bf16.msra.mxu0 %v1138_v11 }
 0x211   :  { %880 = vmatprep.subr.bf16.mxu0 %v1040_v0 }
 0x214   :  { %881 = vmatpush3.bf16.msra.mxu0 %v1146_v12 }
 0x215   :  { %882 = vmatprep.subr.bf16.mxu0 %v1040_v0 }
 0x218   :  { %883 = vmatpush3.bf16.msra.mxu0 %v1156_v13 }
 0x219   :  { %884 = vmatprep.subr.bf16.mxu0 %v1040_v0 }
 0x21c   :  { %885 = vmatpush3.bf16.msra.mxu0 %v1165_v14 }
 0x21d   :  { %886 = vmatprep.subr.bf16.mxu0 %v1040_v0 }
 0x220   :  { %887 = vmatpush3.bf16.msra.mxu0 %v1174_v15 }
 0x221   :  { %888 = vmatprep.subr.bf16.mxu0 %v1040_v0 }
 0x224   :  { %889 = vmatpush3.bf16.msra.mxu0 %v1183_v16 }
 0x225   :  { %914 = vmatprep.subr.bf16.mxu0 %v1040_v0 }
 0x2da   :  { %v284_v36 = vpop.f32.mrb[4].mxu0 }
 0x2db   :  { %v292_v37 = vadd.f32 %v291_v35, %v284_v36  ;;  %v852_v38 = vpop.f32.mrb[5].mxu0 }
 0x2dc   :  { %v287_v39 = vpop.f32.mrb[6].mxu0 }
 0x2dd   :  { %1005 = vtanh.f32 %v292_v37  ;;  %v853_v40 = vpop.f32.mrb[7].mxu0 }
 0x2e7   :  { %v1006_v41 = vpop.eup %1005 }
 0x2e8   :  { %v294_v42 = vpack.c.bf16 %v1006_v41, %v1006_v41 }
 0x2ea   :  { %871 = vmatmul.mubr.bf16.vlgmr.msra.gmra.mrb[4].mxu1 %v294_v42 }
 0x2eb   :  { %895 = vmatpush3.bf16.msra.mxu1 %v1118_v9  ;;  %910 = vmatprep.mubr.msk.bf16.mxu1 %vm1041_vm0, %v1040_v0 }
 0x2ec   :  { %896 = vmatprep.subr.bf16.mxu1 %v1040_v0 }
 0x2ef   :  { %897 = vmatpush3.bf16.msra.mxu1 %v1129_v10 }
 0x2f0   :  { %898 = vmatprep.subr.bf16.mxu1 %v1040_v0 }
 0x2f3   :  { %899 = vmatpush3.bf16.msra.mxu1 %v1138_v11 }
 0x2f4   :  { %900 = vmatprep.subr.bf16.mxu1 %v1040_v0 }
 0x2f7   :  { %901 = vmatpush3.bf16.msra.mxu1 %v1146_v12 }
 0x2f8   :  { %902 = vmatprep.subr.bf16.mxu1 %v1040_v0 }
 0x2fb   :  { %903 = vmatpush3.bf16.msra.mxu1 %v1156_v13 }
 0x2fc   :  { %904 = vmatprep.subr.bf16.mxu1 %v1040_v0 }
 0x2ff   :  { %905 = vmatpush3.bf16.msra.mxu1 %v1165_v14 }
 0x300   :  { %906 = vmatprep.subr.bf16.mxu1 %v1040_v0 }
 0x303   :  { %907 = vmatpush3.bf16.msra.mxu1 %v1174_v15 }
 0x304   :  { %908 = vmatprep.subr.bf16.mxu1 %v1040_v0 }
 0x307   :  { %909 = vmatpush3.bf16.msra.mxu1 %v1183_v16 }
 0x308   :  { %934 = vmatprep.subr.bf16.mxu1 %v1040_v0 }
 0x3bd   :  { %v329_v44 = vpop.f32.mrb[4].mxu1 }
 0x3be   :  { %v337_v45 = vadd.f32 %v336_v43, %v329_v44  ;;  %v872_v46 = vpop.f32.mrb[5].mxu1 }
 0x3bf   :  { %v332_v47 = vpop.f32.mrb[6].mxu1 }
 0x3c0   :  { %1007 = vtanh.f32 %v337_v45  ;;  %v873_v48 = vpop.f32.mrb[7].mxu1 }
 0x3ca   :  { %v1008_v49 = vpop.eup %1007 }
 0x3cb   :  { %v339_v50 = vpack.c.bf16 %v1008_v49, %v1008_v49 }
 0x3cd   :  { %891 = vmatmul.mubr.bf16.vlgmr.msra.gmra.mrb[8].mxu0 %v339_v50 }
 0x3ce   :  { %915 = vmatpush3.bf16.msra.mxu0 %v1118_v9  ;;  %930 = vmatprep.mubr.msk.bf16.mxu0 %vm1041_vm0, %v1040_v0 }
 0x3cf   :  { %916 = vmatprep.subr.bf16.mxu0 %v1040_v0 }
 0x3d2   :  { %917 = vmatpush3.bf16.msra.mxu0 %v1129_v10 }
 0x3d3   :  { %918 = vmatprep.subr.bf16.mxu0 %v1040_v0 }
 0x3d6   :  { %919 = vmatpush3.bf16.msra.mxu0 %v1138_v11 }
 0x3d7   :  { %920 = vmatprep.subr.bf16.mxu0 %v1040_v0 }
 0x3da   :  { %921 = vmatpush3.bf16.msra.mxu0 %v1146_v12 }
 0x3db   :  { %922 = vmatprep.subr.bf16.mxu0 %v1040_v0 }
 0x3de   :  { %923 = vmatpush3.bf16.msra.mxu0 %v1156_v13 }
 0x3df   :  { %924 = vmatprep.subr.bf16.mxu0 %v1040_v0 }
 0x3e2   :  { %925 = vmatpush3.bf16.msra.mxu0 %v1165_v14 }
 0x3e3   :  { %926 = vmatprep.subr.bf16.mxu0 %v1040_v0 }
 0x3e6   :  { %927 = vmatpush3.bf16.msra.mxu0 %v1174_v15 }
 0x3e7   :  { %928 = vmatprep.subr.bf16.mxu0 %v1040_v0 }
 0x3ea   :  { %929 = vmatpush3.bf16.msra.mxu0 %v1183_v16 }
 0x3eb   :  { %954 = vmatprep.subr.bf16.mxu0 %v1040_v0 }
 0x4a0   :  { %v374_v52 = vpop.f32.mrb[8].mxu0 }
 0x4a1   :  { %v382_v53 = vadd.f32 %v381_v51, %v374_v52  ;;  %v892_v54 = vpop.f32.mrb[9].mxu0 }
 0x4a2   :  { %v377_v55 = vpop.f32.mrb[10].mxu0 }
 0x4a3   :  { %1009 = vtanh.f32 %v382_v53  ;;  %v893_v56 = vpop.f32.mrb[11].mxu0 }
 0x4ad   :  { %v1010_v57 = vpop.eup %1009 }
 0x4ae   :  { %v384_v58 = vpack.c.bf16 %v1010_v57, %v1010_v57 }
 0x4b0   :  { %911 = vmatmul.mubr.bf16.vlgmr.msra.gmra.mrb[8].mxu1 %v384_v58 }
 0x4b1   :  { %935 = vmatpush3.bf16.msra.mxu1 %v1118_v9  ;;  %950 = vmatprep.mubr.msk.bf16.mxu1 %vm1041_vm0, %v1040_v0 }
 0x4b2   :  { %936 = vmatprep.subr.bf16.mxu1 %v1040_v0 }
 0x4b5   :  { %937 = vmatpush3.bf16.msra.mxu1 %v1129_v10 }
 0x4b6   :  { %938 = vmatprep.subr.bf16.mxu1 %v1040_v0 }
 0x4b9   :  { %939 = vmatpush3.bf16.msra.mxu1 %v1138_v11 }
 0x4ba   :  { %940 = vmatprep.subr.bf16.mxu1 %v1040_v0 }
 0x4bd   :  { %941 = vmatpush3.bf16.msra.mxu1 %v1146_v12 }
 0x4be   :  { %942 = vmatprep.subr.bf16.mxu1 %v1040_v0 }
 0x4c1   :  { %943 = vmatpush3.bf16.msra.mxu1 %v1156_v13 }
 0x4c2   :  { %944 = vmatprep.subr.bf16.mxu1 %v1040_v0 }
 0x4c5   :  { %945 = vmatpush3.bf16.msra.mxu1 %v1165_v14 }
 0x4c6   :  { %946 = vmatprep.subr.bf16.mxu1 %v1040_v0 }
 0x4c9   :  { %947 = vmatpush3.bf16.msra.mxu1 %v1174_v15 }
 0x4ca   :  { %948 = vmatprep.subr.bf16.mxu1 %v1040_v0 }
 0x4cd   :  { %949 = vmatpush3.bf16.msra.mxu1 %v1183_v16  ;;  %v997_v16 = vld [vmem:[%s1344_s3 + $0x20] sm:$0xff]  }
 0x583   :  { %v419_v60 = vpop.f32.mrb[8].mxu1 }
 0x584   :  { %v427_v61 = vadd.f32 %v426_v59, %v419_v60  ;;  %v912_v62 = vpop.f32.mrb[9].mxu1 }
 0x585   :  { %v422_v63 = vpop.f32.mrb[10].mxu1 }
 0x586   :  { %1011 = vtanh.f32 %v427_v61  ;;  %v913_v1 = vpop.f32.mrb[11].mxu1 }
 0x590   :  { %v1012_v2 = vpop.eup %1011 }
 0x591   :  { %v429_v3 = vpack.c.bf16 %v1012_v2, %v1012_v2 }
 0x593   :  { %931 = vmatmul.mubr.bf16.vlgmr.msra.gmra.mrb[12].mxu0 %v429_v3 }
 0x594   :  { %970 = vmatprep.mubr.msk.bf16.mxu0 %vm1041_vm0, %v1040_v0  ;;  %955 = vmatpush3.bf16.msra.mxu0 %v993_v4 }
 0x595   :  { %956 = vmatprep.subr.bf16.mxu0 %v1040_v0 }
 0x598   :  { %957 = vmatpush3.bf16.msra.mxu0 %v994_v5 }
 0x599   :  { %958 = vmatprep.subr.bf16.mxu0 %v1040_v0 }
 0x59c   :  { %959 = vmatpush3.bf16.msra.mxu0 %v995_v6 }
 0x59d   :  { %960 = vmatprep.subr.bf16.mxu0 %v1040_v0 }
 0x5a0   :  { %961 = vmatpush3.bf16.msra.mxu0 %v996_v7 }
 0x5a1   :  { %962 = vmatprep.subr.bf16.mxu0 %v1040_v0 }
 0x5a4   :  { %963 = vmatpush3.bf16.msra.mxu0 %v997_v16 }
 0x5a5   :  { %964 = vmatprep.subr.bf16.mxu0 %v1040_v0 }
 0x5a8   :  { %965 = vmatpush3.bf16.msra.mxu0 %v998_v17 }
 0x5a9   :  { %966 = vmatprep.subr.bf16.mxu0 %v1040_v0 }
 0x5ac   :  { %967 = vmatpush3.bf16.msra.mxu0 %v999_v18 }
 0x5ad   :  { %968 = vmatprep.subr.bf16.mxu0 %v1040_v0  ;;  %v704_v0 = vld [vmem:[%s1345_s4] ss:$0 sm:$0xff] }
 0x5b0   :  { %969 = vmatpush3.bf16.msra.mxu0 %v1000_v19 }
 0x666   :  { %v464_v9 = vpop.f32.mrb[12].mxu0 }
 0x667   :  { %v472_v10 = vadd.f32 %v471_v8, %v464_v9  ;;  %v932_v11 = vpop.f32.mrb[13].mxu0 }
 0x668   :  { %v467_v12 = vpop.f32.mrb[14].mxu0 }
 0x669   :  { %1013 = vtanh.f32 %v472_v10  ;;  %v933_v13 = vpop.f32.mrb[15].mxu0 }
 0x673   :  { %v1014_v14 = vpop.eup %1013 }
 0x674   :  { %v474_v15 = vpack.c.bf16 %v1014_v14, %v1014_v14 }
 0x676   :  { %951 = vmatmul.mubr.bf16.vlgmr.msra.gmra.mrb[12].mxu1 %v474_v15 }
 0x749   :  { %v509_v21 = vpop.f32.mrb[12].mxu1 }
 0x74a   :  { %v517_v22 = vadd.f32 %v516_v20, %v509_v21  ;;  %v952_v23 = vpop.f32.mrb[13].mxu1 }
 0x74b   :  { %v512_v24 = vpop.f32.mrb[14].mxu1 }
 0x74c   :  { %1015 = vtanh.f32 %v517_v22  ;;  %v953_v25 = vpop.f32.mrb[15].mxu1 }
 0x756   :  { %v1016_v26 = vpop.eup %1015 }
 0x757   :  { %519 = vst [vmem:[#allocation3] sm:$0xff] %v1016_v26  ;;  %523 = vst [vmem:[%s1347_s6] sm:$0xff] %v1016_v26  ;;  %v524_v27 = vpack.c.bf16 %v1016_v26, %v1016_v26 }
 0x759   :  { %971 = vmatmul.mubr.bf16.vlgmr.msra.gmra.mrb[16].mxu0 %v524_v27 }
 0x82c   :  { %v630_v28 = vpop.f32.mrb[16].mxu0 }
 0x82d   :  { %v631_v29 = vadd.f32 %v704_v0, %v630_v28  ;;  %v972_v30 = vpop.f32.mrb[17].mxu0 }
 0x82e   :  { %v633_v31 = vpop.f32.mrb[18].mxu0 }
 0x82f   :  { %636 = vst [vmem:[%s1346_s5] sm:$0xff] %v631_v29  ;;  %v973_v32 = vpop.f32.mrb[19].mxu0 }

</bundles_post_ra>
